<compile_context>
chip_gen: v6e
topology: v6e:2x2x1
jax: 0.10.0
libtpu: 0.0.40
codegen_flags: <defaults>
</compile_context>

<pallas_src>
import functools

import jax
import jax.numpy as jnp
from jax.experimental import pallas as pl
from jax.experimental.pallas import tpu as pltpu


# ~4 MiB per streamed block already sits at ~85% of the HBM roofline; with
# in+out double buffering that is ~16 MiB of VMEM -- safe on v5e/v6e/v7x.
_BLOCK_BYTES_TARGET = 4 * 1024 * 1024


def _vmem_limit_bytes(buffer_bytes):
    # Actual buffers + headroom for compiler internals; floor at 32 MiB
    # (>= the scoped defaults), cap below v7x's 64 MiB physical VMEM.
    return int(min(max(buffer_bytes + (4 << 20), 32 << 20), 60 << 20))


def _largest_divisor_at_most(n, cap):
    cap = max(1, min(n, int(cap)))
    for d in range(cap, 0, -1):
        if n % d == 0:
            return d
    return 1


def _pick_hw_tile(hw, max_elems):
    """Largest multiple of 128 that divides hw and is <= max_elems (or None)."""
    best = None
    t = 128
    while t <= hw and t <= max_elems:
        if hw % t == 0:
            best = t
        t += 128
    return best


# --------------------------------------------------------------------------
# Fused single-pass kernel: one grid step handles Bt full batch elements.
# --------------------------------------------------------------------------
def _se_fused_kernel(x_ref, w1t_ref, w2t_ref, o_ref):
    # x_ref: (Bt, C, HW)   w1t: (C, Hd)   w2t: (Hd, C)   o_ref: (Bt, C, HW)
    xf = x_ref[...].astype(jnp.float32)
    pooled = jnp.mean(xf, axis=-1)                                    # (Bt, C)
    h = jnp.dot(pooled, w1t_ref[...], preferred_element_type=jnp.float32)  # (Bt, Hd)
    h = h * jax.nn.sigmoid(h)                                         # SiLU
    g = jax.nn.sigmoid(
        jnp.dot(h, w2t_ref[...], preferred_element_type=jnp.float32))  # (Bt, C)
    # Re-load x from VMEM for the gating multiply instead of keeping the whole
    # (potentially multi-MB) block live in vregs across the pool + MLP.  The
    # g[:, :, None] relayout touches only a (Bt, C) sub-vreg tensor.
    o_ref[...] = (x_ref[...].astype(jnp.float32) * g[:, :, None]).astype(o_ref.dtype)


# --------------------------------------------------------------------------
# Two-pass kernels (used when a full (C, HW) slab does not fit VMEM).
# --------------------------------------------------------------------------
def _se_pool_mlp_kernel(x_ref, w1t_ref, w2t_ref, g_ref, acc_ref, *, inv_hw):
    # Grid: (B, n_hw_tiles), HW-tile axis is the (innermost) reduction axis.
    t = pl.program_id(1)

    @pl.when(t == 0)
    def _():
        acc_ref[...] = jnp.zeros_like(acc_ref)

    acc_ref[...] += jnp.sum(x_ref[...].astype(jnp.float32), axis=-1)  # (1, C)

    @pl.when(t == pl.num_programs(1) - 1)
    def _():
        pooled = acc_ref[...] * inv_hw                                # (1, C)
        h = jnp.dot(pooled, w1t_ref[...], preferred_element_type=jnp.float32)
        h = h * jax.nn.sigmoid(h)                                     # SiLU
        g = jax.nn.sigmoid(
            jnp.dot(h, w2t_ref[...], preferred_element_type=jnp.float32))  # (1, C)
        # Store the gate with C on the sublane axis so pass 2 broadcasts it
        # along the lane (HW) axis with no per-tile relayout.
        g_ref[...] = g[:, :, None]                                    # (1, C, 1)


def _se_gate_kernel(x_ref, g_ref, o_ref):
    # x_ref: (1, C, hw_t)   g_ref: (1, C, 1) -> broadcast along lanes.
    o_ref[...] = (x_ref[...].astype(jnp.float32) * g_ref[...]).astype(o_ref.dtype)


# --------------------------------------------------------------------------
# Wrapper
# --------------------------------------------------------------------------
def squeeze_excitation(x, w1, w2, *, force_two_pass=False,
                       max_block_bytes=_BLOCK_BYTES_TARGET,
                       donate_input=False):
    """SqueezeExcitation forward.

    x:  (B, C, H, W)
    w1: (hidden, C)  -- torch nn.Linear layout (out, in), no bias
    w2: (C, hidden)  -- torch nn.Linear layout (out, in), no bias
    donate_input: alias x's HBM buffer to the output (only enable when the
        caller donates x; halves HBM footprint, bandwidth unchanged).
    """
    B, C, H, W = x.shape
    HW = H * W
    itemsize = jnp.dtype(x.dtype).itemsize
    x_flat = x.reshape(B, C, HW)
    w1t = jnp.asarray(w1).T    # (C, hidden)
    w2t = jnp.asarray(w2).T    # (hidden, C)
    weight_bytes = (w1t.size + w2t.size) * 4

    slab_bytes = C * HW * itemsize      # one batch element's activation slab
    alias = {0: 0} if donate_input else {}

    if (not force_two_pass) and slab_bytes <= max_block_bytes:
        # ---------------- fused path: x read from HBM exactly once ----------
        bt = _largest_divisor_at_most(B, max_block_bytes // max(slab_bytes, 1))
        block_bytes = bt * slab_bytes
        vmem_limit = _vmem_limit_bytes(2 * 2 * block_bytes + 2 * weight_bytes)
        out_flat = pl.pallas_call(
            _se_fused_kernel,
            out_shape=jax.ShapeDtypeStruct((B, C, HW), x.dtype),
            grid=(B // bt,),
            in_specs=[
                pl.BlockSpec((bt, C, HW), lambda b: (b, 0, 0)),
                pl.BlockSpec(w1t.shape, lambda b: (0, 0)),   # resident weights
                pl.BlockSpec(w2t.shape, lambda b: (0, 0)),
            ],
            out_specs=pl.BlockSpec((bt, C, HW), lambda b: (b, 0, 0)),
            compiler_params=pltpu.CompilerParams(
                dimension_semantics=("parallel",),
                vmem_limit_bytes=vmem_limit,
            ),
            input_output_aliases=alias,
        )(x_flat, w1t, w2t)
        return out_flat.reshape(B, C, H, W)

    # -------------------- two-pass path (HW tiled) ---------------------------
    hw_t = _pick_hw_tile(HW, max(1, max_block_bytes // (C * itemsize)))
    if hw_t is None:
        # TODO(synk): HW not tileable by 128 lanes; fall back to full-HW blocks
        # (may require a larger VMEM limit for extreme spatial sizes).
        hw_t = HW
    n_t = HW // hw_t
    tile_bytes = C * hw_t * itemsize

    # Pass 1: streaming mean-pool (+ tiny MLP at the last tile) -> g (B, C, 1).
    pool_kernel = functools.partial(_se_pool_mlp_kernel, inv_hw=1.0 / HW)
    g = pl.pallas_call(
        pool_kernel,
        out_shape=jax.ShapeDtypeStruct((B, C, 1), jnp.float32),
        grid=(B, n_t),
        in_specs=[
            pl.BlockSpec((1, C, hw_t), lambda b, t: (b, 0, t)),
            pl.BlockSpec(w1t.shape, lambda b, t: (0, 0)),
            pl.BlockSpec(w2t.shape, lambda b, t: (0, 0)),
        ],
        out_specs=pl.BlockSpec((1, C, 1), lambda b, t: (b, 0, 0)),
        scratch_shapes=[pltpu.VMEM((1, C), jnp.float32)],
        compiler_params=pltpu.CompilerParams(
            dimension_semantics=("parallel", "arbitrary"),
            vmem_limit_bytes=_vmem_limit_bytes(2 * tile_bytes + 2 * weight_bytes),
        ),
    )(x_flat, w1t, w2t)

    # Pass 2: re-stream x and apply the gate (fully parallel grid).
    out_flat = pl.pallas_call(
        _se_gate_kernel,
        out_shape=jax.ShapeDtypeStruct((B, C, HW), x.dtype),
        grid=(B, n_t),
        in_specs=[
            pl.BlockSpec((1, C, hw_t), lambda b, t: (b, 0, t)),
            pl.BlockSpec((1, C, 1), lambda b, t: (b, 0, 0)),
        ],
        out_specs=pl.BlockSpec((1, C, hw_t), lambda b, t: (b, 0, t)),
        compiler_params=pltpu.CompilerParams(
            dimension_semantics=("parallel", "parallel"),
            vmem_limit_bytes=_vmem_limit_bytes(2 * 2 * tile_bytes),
        ),
        input_output_aliases=alias,
    )(x_flat, g)
    return out_flat.reshape(B, C, H, W)


def _reference(x, w1, w2):
    pooled = jnp.mean(x, axis=(2, 3))                # (B, C)
    h = pooled @ w1.T                                # (B, hidden)
    h = h * jax.nn.sigmoid(h)                        # SiLU
    g = jax.nn.sigmoid(h @ w2.T)                     # (B, C)
    return x * g[:, :, None, None]


if __name__ == "__main__":
    key = jax.random.PRNGKey(0)
    k_x, k_w1, k_w2 = jax.random.split(key, 3)

    # Small shapes consistent with the module (shrinkage_rate=0.25 -> hidden=2).
    # HW = 256 is a multiple of 128, so lane stores are unmasked vst.
    B, C, H, W = 2, 8, 16, 16
    shrinkage_rate = 0.25
    hidden = int(C * shrinkage_rate)                 # = 2

    x = jax.random.normal(k_x, (B, C, H, W), dtype=jnp.float32)
    # torch nn.Linear layout: (out_features, in_features), no bias.
    w1 = jax.random.normal(k_w1, (hidden, C), dtype=jnp.float32) * 0.1
    w2 = jax.random.normal(k_w2, (C, hidden), dtype=jnp.float32) * 0.1

    ref = _reference(x, w1, w2)

    # Fused single-pass path (both batch elements packed into one grid step).
    out_fused = jax.block_until_ready(squeeze_excitation(x, w1, w2))
    assert out_fused.shape == (B, C, H, W)
    assert jnp.allclose(out_fused, ref, atol=1e-5, rtol=1e-5)

    # Two-pass path, forced with a tiny block budget so the HW axis is tiled
    # (exercises the streaming pooled-sum accumulation + gate re-stream).
    out_tiled = jax.block_until_ready(
        squeeze_excitation(x, w1, w2, force_two_pass=True,
                           max_block_bytes=C * 128 * 4))
    assert out_tiled.shape == (B, C, H, W)
    assert jnp.allclose(out_tiled, ref, atol=1e-5, rtol=1e-5)

    print("KERNEL_OK")
</pallas_src>

<mosaic_0001>
module attributes {stable_mosaic.version = 11 : i64} {
  func.func @_se_fused_kernel(%arg0: i32, %arg1: memref<2x8x256xf32, #tpu.memory_space<vmem>>, %arg2: memref<8x2xf32, #tpu.memory_space<vmem>>, %arg3: memref<2x8xf32, #tpu.memory_space<vmem>>, %arg4: memref<2x8x256xf32, #tpu.memory_space<vmem>>) attributes {dimension_semantics = [#tpu.dimension_semantics<parallel>], iteration_bounds = array<i64: 1>, scalar_prefetch = 0 : i64, scratch_operands = 0 : i64, tpu.core_type = #tpu.core_type<tc>, window_params = [{transform_indices = @transform_0, window_bounds = array<i64: 2, 8, 256>}, {pipeline_mode = #tpu.pipeline_mode<synchronous>, transform_indices = @transform_1, window_bounds = array<i64: 8, 2>}, {pipeline_mode = #tpu.pipeline_mode<synchronous>, transform_indices = @transform_2, window_bounds = array<i64: 2, 8>}, {transform_indices = @transform_3, window_bounds = array<i64: 2, 8, 256>}]} {
    %c0 = arith.constant 0 : index
    %c0_0 = arith.constant 0 : index
    %c0_1 = arith.constant 0 : index
    %0 = vector.load %arg1[%c0, %c0_0, %c0_1] : memref<2x8x256xf32, #tpu.memory_space<vmem>>, vector<2x8x256xf32>
    %cst = arith.constant dense<0.000000e+00> : vector<2x8xf32>
    %1 = vector.multi_reduction <add>, %0, %cst [2] : vector<2x8x256xf32> to vector<2x8xf32>
    %cst_2 = arith.constant 2.560000e+02 : f32
    %2 = vector.broadcast %cst_2 : f32 to vector<2x8xf32>
    %3 = arith.divf %1, %2 : vector<2x8xf32>
    %c0_3 = arith.constant 0 : index
    %c0_4 = arith.constant 0 : index
    %4 = vector.load %arg2[%c0_3, %c0_4] : memref<8x2xf32, #tpu.memory_space<vmem>>, vector<8x2xf32>
    %cst_5 = arith.constant dense<0.000000e+00> : vector<2x2xf32>
    %5 = tpu.matmul %3, %4, %cst_5 {dimension_numbers = #tpu.dot_dimension_numbers<[1], [0], [0], [1], [0, 0, 1, 1], [], []>} : vector<2x8xf32>, vector<8x2xf32>, vector<2x2xf32> -> vector<2x2xf32>
    %6 = arith.negf %5 : vector<2x2xf32>
    %7 = math.exp %6 : vector<2x2xf32>
    %cst_6 = arith.constant 1.000000e+00 : f32
    %8 = vector.broadcast %cst_6 : f32 to vector<2x2xf32>
    %9 = arith.addf %8, %7 : vector<2x2xf32>
    %10 = arith.divf %8, %9 : vector<2x2xf32>
    %11 = arith.mulf %5, %10 : vector<2x2xf32>
    %c0_7 = arith.constant 0 : index
    %c0_8 = arith.constant 0 : index
    %12 = vector.load %arg3[%c0_7, %c0_8] : memref<2x8xf32, #tpu.memory_space<vmem>>, vector<2x8xf32>
    %cst_9 = arith.constant dense<0.000000e+00> : vector<2x8xf32>
    %13 = tpu.matmul %11, %12, %cst_9 {dimension_numbers = #tpu.dot_dimension_numbers<[1], [0], [0], [1], [0, 0, 1, 1], [], []>} : vector<2x2xf32>, vector<2x8xf32>, vector<2x8xf32> -> vector<2x8xf32>
    %14 = arith.negf %13 : vector<2x8xf32>
    %15 = math.exp %14 : vector<2x8xf32>
    %cst_10 = arith.constant 1.000000e+00 : f32
    %16 = vector.broadcast %cst_10 : f32 to vector<2x8xf32>
    %17 = arith.addf %16, %15 : vector<2x8xf32>
    %18 = arith.divf %16, %17 : vector<2x8xf32>
    %c0_11 = arith.constant 0 : index
    %c0_12 = arith.constant 0 : index
    %c0_13 = arith.constant 0 : index
    %19 = vector.load %arg1[%c0_11, %c0_12, %c0_13] : memref<2x8x256xf32, #tpu.memory_space<vmem>>, vector<2x8x256xf32>
    %20 = vector.shape_cast %18 : vector<2x8xf32> to vector<2x8x1xf32>
    %21 = vector.broadcast %20 : vector<2x8x1xf32> to vector<2x8x256xf32>
    %22 = arith.mulf %19, %21 : vector<2x8x256xf32>
    %c0_14 = arith.constant 0 : index
    %c0_15 = arith.constant 0 : index
    %c0_16 = arith.constant 0 : index
    %23 = vector.load %arg4[%c0_14, %c0_15, %c0_16] : memref<2x8x256xf32, #tpu.memory_space<vmem>>, vector<2x8x256xf32>
    tpu.vector_store %arg4[%c0_14, %c0_15, %c0_16], %22 {strides = array<i32>} : memref<2x8x256xf32, #tpu.memory_space<vmem>>, vector<2x8x256xf32>,
    return
  }
  func.func @transform_0(%arg0: i32) -> (i32, i32, i32) {
    %c0_i32 = arith.constant 0 : i32
    %c0_i32_0 = arith.constant 0 : i32
    %c0_i32_1 = arith.constant 0 : i32
    return %arg0, %c0_i32, %c0_i32_0 : i32, i32, i32
  }
  func.func @transform_1(%arg0: i32) -> (i32, i32) {
    %c0_i32 = arith.constant 0 : i32
    %c0_i32_0 = arith.constant 0 : i32
    %c0_i32_1 = arith.constant 0 : i32
    return %c0_i32, %c0_i32_0 : i32, i32
  }
  func.func @transform_2(%arg0: i32) -> (i32, i32) {
    %c0_i32 = arith.constant 0 : i32
    %c0_i32_0 = arith.constant 0 : i32
    %c0_i32_1 = arith.constant 0 : i32
    return %c0_i32, %c0_i32_0 : i32, i32
  }
  func.func @transform_3(%arg0: i32) -> (i32, i32, i32) {
    %c0_i32 = arith.constant 0 : i32
    %c0_i32_0 = arith.constant 0 : i32
    %c0_i32_1 = arith.constant 0 : i32
    return %arg0, %c0_i32, %c0_i32_0 : i32, i32, i32
  }
}

</mosaic_0001>

<bundles_post_ra>
// kernel: tpu_custom_call.1
= control target key start
LH: loop header
LB: loop body
LE: loop exit
PB: predicated region body
PF: predicated region fallthrough
CT: control target
= control target key end

     0   :  { %8 = vsyncpa [#allocation3], 0  ;;  %s390_s0 = inlined_call_operand.hbm [shape: f32[2,8,256], index: 0, kind: input, shape index: {}]   ;;  %s391_s1 = inlined_call_operand.vmem [shape: f32[8,2], index: 1, kind: input, shape index: {}]   ;;  %s392_s2 = inlined_call_operand.vmem [shape: f32[2,8], index: 2, kind: input, shape index: {}]   ;;  %s393_s3 = inlined_call_operand.hbm [shape: f32[2,8,256], index: 3, kind: output, shape index: {}]  }
   0x1   :  { %9 = vsyncpa [#allocation4], 0  ;;  %s338_s12 = smov [#allocation2]  }
   0x2   :  { %s15_s13 = sshll.u32 %s338_s12, 4  ;;  %s16_s13 = int_to_ptr.vmem [resolvable:$true] %s15_s13 }
   0x3   :  { %s302_s14 = scalar_lea.vmem %s16_s13, 512  ;;  %p307_p1 = scmp.lt.s32.totalorder %s16_s13, %s16_s13 }
   0x4   :  { %p303_p0 = scmp.ne.s32.totalorder %s16_s13, %s302_s14  ;;  %p308_p2 = scmp.lt.s32.totalorder %s302_s14, %s302_s14 }
   0x6   :  { %p309_p3 = por %p308_p2, %p307_p1 }
   0x8   :  { %p310_p4 = pnand %p309_p3, %p303_p0 }
   0xa   :  { %313 = shalt.err (!%p310_p4)
}
   0xb   :  { %s339_s15 = smov 256   ;;  %s340_s16 = smov 16  }
   0xc   :  { %21 = dma.hbm_to_vmem [thread:$0]  %s390_s0, 512, %s16_s13, [#allocation3], %s339_s15, %s339_s15, %s340_s16  }
   0xd   :  { %334 = dma.done.wait [#allocation3], 512  }
   0xe   :  { %335 = vsyncadd [#allocation3], 4294966784  ;;  %v29_v0 = vld [vmem:[#allocation2] sm:$0xff]  ;;  %v30_v1 = vld [vmem:[#allocation2 + $0x8] sm:$0xff]  ;;  %v341_v7 = vmov 0.0   ;;  %vm342_vm0 = vmmov 0   ;;  %v45_v8 = vlaneseq }
   0xf   :  { %v370_v2 = vld [vmem:[#allocation2 + $0x10] sm:$0xff]  ;;  %v33_v3 = vadd.f32 %v30_v1, %v29_v0  ;;  %v372_v4 = vld [vmem:[#allocation2 + $0x18] sm:$0xff]  ;;  %v42_v6 = vld [vmem:[%s391_s1] sm:$0xff]  ;;  %270 = vmatprep.subr.mxu0 %v341_v7  ;;  %272 = vmatprep.mubr.msk.f32.mxu0 %vm342_vm0, %v341_v7  ;;  %vm55_vm1 = vcmask 1041409   ;;  %vm57_vm2 = vcmask 64512   ;;  %vm142_vm3 = vcmask 1041408  }
  0x10   :  { %v36_v5 = vadd.f32 %v372_v4, %v370_v2  ;;  %271 = vmatpush3.msra.mxu0 %v42_v6  ;;  %275 = vmatprep.subr.mxu1 %v341_v7  ;;  %v46_v9 = vand.u32 127, %v45_v8  ;;  %v48_v10 = vshrl.u32 %v45_v8, 7  ;;  %v137_v19 = vld [vmem:[%s392_s2] sm:$0x3]  ;;  %vm138_vm4 = vcmask 15360   ;;  %s343_s2 = smov [#allocation5]  }
  0x11   :  { %34 = vadd.xlane.f32.xlu0 %v33_v3  ;;  %277 = vmatprep.mubr.msk.f32.mxu1 %vm342_vm0, %v341_v7  ;;  %s249_s21 = sshll.u32 %s343_s2, 4  ;;  %s250_s21 = int_to_ptr.vmem [resolvable:$true] %s249_s21 }
  0x12   :  { %v49_v12 = vsub.s32 %v46_v9, %v48_v10  ;;  %276 = vmatpush3.msk.msra.mxu1 %vm142_vm3, %v137_v19  ;;  %v224_v32 = vsub.s32 0, %v48_v10  ;;  %v231_v35 = vsub.s32 1, %v48_v10  ;;  %s314_s22 = scalar_lea.vmem %s250_s21, 512  ;;  %p319_p6 = scmp.lt.s32.totalorder %s250_s21, %s250_s21 }
  0x13   :  { %p315_p5 = scmp.ne.s32.totalorder %s250_s21, %s314_s22  ;;  %p320_p7 = scmp.lt.s32.totalorder %s314_s22, %s314_s22 }
  0x15   :  { %37 = vadd.xlane.f32.xlu0 %v36_v5  ;;  %p321_p8 = por %p320_p7, %p319_p6 }
  0x17   :  { %p322_p9 = pnand %p321_p8, %p315_p5 }
  0x9a   :  { %v35_v11 = vpop.xlane.xlu0 %34 }
  0x9b   :  { %v40_v13 = vmul.f32 0.00390625, %v35_v11 }
  0x9d   :  { %v50_v16 = vrot.slane %v40_v13, %v49_v12 }
  0x9e   :  { %v38_v14 = vpop.xlane.xlu0 %37 }
  0x9f   :  { %v41_v15 = vmul.f32 0.00390625, %v38_v14 }
  0xa1   :  { %v54_v17 = vrot.slane %v41_v15, %v49_v12 }
  0xa3   :  { %v56_v18 = vsel %vm55_vm1, %v54_v17, %v50_v16 }
  0xa4   :  { %273 = vmatmul.mubr.msk.f32.vlgmr.msra.gmra.mxu0 %vm57_vm2, %v56_v18 }
 0x164   :  { %v126_v20 = vpop.f32.mrf.mxu0 }
 0x165   :  { %v262_v21 = vmul.f32 -1.442695, %v126_v20 }
 0x166   :  { %v274_v22 = vpop.f32.mrf.mxu0 }
 0x167   :  { %286 = vpow2.f32 %v262_v21 }
 0x174   :  { %v287_v23 = vpop.eup %286 }
 0x175   :  { %v133_v24 = vadd.f32 1.0, %v287_v23 }
 0x177   :  { %288 = vrcp.f32 %v133_v24 }
 0x184   :  { %v289_v25 = vpop.eup %288 }
 0x185   :  { %v136_v26 = vmul.f32 %v289_v25, %v126_v20 }
 0x187   :  { %278 = vmatmul.mubr.msk.f32.vlgmr.msra.gmra.mxu1 %vm138_vm4, %v136_v26 }
 0x247   :  { %v212_v27 = vpop.f32.mrf.mxu1 }
 0x248   :  { %v265_v28 = vmul.f32 -1.442695, %v212_v27 }
 0x249   :  { %v279_v29 = vpop.f32.mrf.mxu1 }
 0x24a   :  { %290 = vpow2.f32 %v265_v28 }
 0x257   :  { %v291_v30 = vpop.eup %290 }
 0x258   :  { %v219_v31 = vadd.f32 1.0, %v291_v30 }
 0x25a   :  { %292 = vrcp.f32 %v219_v31 }
 0x267   :  { %v293_v33 = vpop.eup %292 }
 0x268   :  { %v225_v34 = vrot.slane %v293_v33, %v224_v32  ;;  %v232_v36 = vrot.slane %v293_v33, %v231_v35 }
 0x26a   :  { %227 = vbcast.lane.b32.xlu1 %v225_v34, 256 }
 0x26e   :  { %234 = vbcast.lane.b32.xlu1 %v232_v36, 256 }
 0x2dc   :  { %v228_v37 = vpop.permute.xlu1 %227 }
 0x2dd   :  { %v236_v38 = vmul.f32 %v228_v37, %v29_v0  ;;  %v237_v39 = vmul.f32 %v228_v37, %v30_v1 }
 0x2df   :  { %240 = vst [vmem:[#allocation5] sm:$0xff] %v236_v38  ;;  %241 = vst [vmem:[#allocation5 + $0x8] sm:$0xff] %v237_v39 }
 0x2e0   :  { %v235_v40 = vpop.permute.xlu1 %234 }
 0x2e1   :  { %v238_v41 = vmul.f32 %v235_v40, %v370_v2  ;;  %v239_v42 = vmul.f32 %v235_v40, %v372_v4 }
 0x2e3   :  { %242 = vst [vmem:[#allocation5 + $0x10] sm:$0xff] %v238_v41  ;;  %243 = vst [vmem:[#allocation5 + $0x18] sm:$0xff] %v239_v42 }
 0x2e4   :  { %325 = shalt.err (!%p322_p9)
}
 0x2e5   :  { %255 = dma.vmem_to_hbm [thread:$0]  %s250_s21, 512, %s393_s3, [#allocation4], %s339_s15, %s339_s15, %s340_s16  }
 0x2e6   :  { %336 = dma.done.wait [#allocation4], 512  }
 0x2e7   :  { %337 = vsyncadd [#allocation4], 4294966784 }
 0x2e8   :  { %259 = vsyncpa [#allocation3], 1 }
 0x2e9   :  { %260 = vsyncpa [#allocation4], 1 }

</bundles_post_ra>
